<compile_context>
chip_gen: v7x
topology: tpu7x:2x2x1
jax: 0.10.0
libtpu: 0.0.40
codegen_flags: <defaults>
</compile_context>

<pallas_src>
import jax
import jax.numpy as jnp
from jax.experimental import pallas as pl
from jax.experimental.pallas import tpu as pltpu


def _round_up(x, m):
    return (x + m - 1) // m * m


def _softplus(z):
    # Numerically stable softplus; matches F.softplus for all finite z.
    return jnp.maximum(z, 0.0) + jnp.log1p(jnp.exp(-jnp.abs(z)))


def dropout_vi_kernel(x_ref, m1_ref, m2_ref, w1_ref, b1_ref, w2_ref, b2_ref,
                      w3_ref, b3_ref, out_ref):
    x = x_ref[...]                                                  # (TILE_N, IN_PAD)

    # layer1 + ReLU + dropout (mask already carries the 1/(1-p) scale)
    h1 = jnp.dot(x, w1_ref[...], preferred_element_type=jnp.float32) + b1_ref[...]
    h1 = jnp.maximum(h1, 0.0) * m1_ref[...]

    # layer2 + ReLU + dropout
    h2 = jnp.dot(h1, w2_ref[...], preferred_element_type=jnp.float32) + b2_ref[...]
    h2 = jnp.maximum(h2, 0.0) * m2_ref[...]

    # output layer
    o = jnp.dot(h2, w3_ref[...], preferred_element_type=jnp.float32) + b3_ref[...]

    # Lane-dense output: transpose (TILE_N, OUT_PAD) -> (OUT_PAD, TILE_N) on the
    # XLU, keep row 0 (mu) and the transformed row 1 (sigma) as a (2, TILE_N) slab.
    o_t = o.T
    mu_row = o_t[0:1, :]
    sigma_row = 0.1 + 0.9 * _softplus(o_t[1:2, :])
    out_ref[...] = jnp.concatenate([mu_row, sigma_row], axis=0)


def dropout_vi_forward(x, params, drop_prob, key, *, max_tile_n=1024):
    """Fused Dropout_VI forward.  Returns (mu, sigma), each shaped (N,).

    params = (w1, b1, w2, b2, w3, b3) with weights stored as (in, out) —
    transposed vs. PyTorch nn.Linear — and biases as (1, out).
    """
    w1, b1, w2, b2, w3, b3 = params
    input_dim, num_units = w1.shape
    out_cols = w3.shape[1]                    # = 2*output_dim (forward uses cols 0, 1)

    x2d = jnp.asarray(x, jnp.float32).reshape(-1, input_dim)    # x.view(-1, input_dim)
    n = x2d.shape[0]

    # Lane-aligned padded feature sizes.
    in_pad = _round_up(input_dim, 128)
    h_pad = _round_up(num_units, 128)
    out_pad = _round_up(max(out_cols, 2), 128)

    # Batch tiling: 128-aligned tile so the transposed (2, TILE_N) store is dense.
    tile_n = min(max_tile_n, _round_up(n, 128))
    n_pad = _round_up(n, tile_n)
    grid = (n_pad // tile_n,)

    f32 = jnp.float32
    xp = jnp.zeros((n_pad, in_pad), f32).at[:n, :input_dim].set(x2d)
    w1p = jnp.zeros((in_pad, h_pad), f32).at[:input_dim, :num_units].set(w1)
    b1p = jnp.zeros((1, h_pad), f32).at[:, :num_units].set(jnp.reshape(b1, (1, -1)))
    w2p = jnp.zeros((h_pad, h_pad), f32).at[:num_units, :num_units].set(w2)
    b2p = jnp.zeros((1, h_pad), f32).at[:, :num_units].set(jnp.reshape(b2, (1, -1)))
    w3p = jnp.zeros((h_pad, out_pad), f32).at[:num_units, :out_cols].set(w3)
    b3p = jnp.zeros((1, out_pad), f32).at[:, :out_cols].set(jnp.reshape(b3, (1, -1)))

    # Inverted-dropout scale masks: values in {0, 1/(1-p)} (training=True as in
    # the reference module).  Fresh, independent masks for every call / element.
    keep = 1.0 - float(drop_prob)
    k1, k2 = jax.random.split(key)
    m1 = jax.random.bernoulli(k1, keep, (n_pad, h_pad)).astype(f32) * (1.0 / keep)
    m2 = jax.random.bernoulli(k2, keep, (n_pad, h_pad)).astype(f32) * (1.0 / keep)

    flops = 2 * n_pad * (in_pad * h_pad + h_pad * h_pad + h_pad * out_pad)
    bytes_accessed = 4 * (xp.size + m1.size + m2.size + w1p.size + b1p.size
                          + w2p.size + b2p.size + w3p.size + b3p.size + 2 * n_pad)
    cost = pl.CostEstimate(flops=flops, transcendentals=2 * n_pad,
                           bytes_accessed=bytes_accessed)

    def resident(shape):
        return pl.BlockSpec(shape, lambda i: (0, 0))

    out = pl.pallas_call(
        dropout_vi_kernel,
        out_shape=jax.ShapeDtypeStruct((2, n_pad), f32),
        grid=grid,
        in_specs=[
            pl.BlockSpec((tile_n, in_pad), lambda i: (i, 0)),   # x tile (pipelined)
            pl.BlockSpec((tile_n, h_pad), lambda i: (i, 0)),    # dropout mask 1
            pl.BlockSpec((tile_n, h_pad), lambda i: (i, 0)),    # dropout mask 2
            resident((in_pad, h_pad)),                          # W1 (VMEM-resident)
            resident((1, h_pad)),                               # b1
            resident((h_pad, h_pad)),                           # W2
            resident((1, h_pad)),                               # b2
            resident((h_pad, out_pad)),                         # W3
            resident((1, out_pad)),                             # b3
        ],
        out_specs=pl.BlockSpec((2, tile_n), lambda i: (0, i)),
        compiler_params=pltpu.CompilerParams(
            dimension_semantics=("parallel",)),
        cost_estimate=cost,
    )(xp, m1, m2, w1p, b1p, w2p, b2p, w3p, b3p)

    return out[0, :n], out[1, :n]


def init_params(key, input_dim, num_units, output_dim):
    """Init matching nn.Linear defaults (uniform +-1/sqrt(fan_in)).

    Weights are stored as (in_features, out_features) — transposed vs. PyTorch.
    """
    def linear(k, fan_in, fan_out):
        kw, kb = jax.random.split(k)
        bound = 1.0 / jnp.sqrt(fan_in)
        w = jax.random.uniform(kw, (fan_in, fan_out), jnp.float32, -bound, bound)
        b = jax.random.uniform(kb, (1, fan_out), jnp.float32, -bound, bound)
        return w, b

    k1, k2, k3 = jax.random.split(key, 3)
    w1, b1 = linear(k1, input_dim, num_units)
    w2, b2 = linear(k2, num_units, num_units)
    w3, b3 = linear(k3, num_units, output_dim * 2)
    return (w1, b1, w2, b2, w3, b3)


def _reference_forward_no_dropout(x, params):
    """Plain-JAX reference of the module forward with drop_prob = 0."""
    w1, b1, w2, b2, w3, b3 = params
    x2d = jnp.asarray(x, jnp.float32).reshape(-1, w1.shape[0])
    h1 = jnp.maximum(x2d @ w1 + b1, 0.0)
    h2 = jnp.maximum(h1 @ w2 + b2, 0.0)
    o = h2 @ w3 + b3
    mu = o[:, 0]
    sigma = 0.1 + 0.9 * _softplus(o[:, 1])
    return mu, sigma


if __name__ == "__main__":
    input_dim, num_units, output_dim = 32, 32, 1
    batch = 8

    key = jax.random.PRNGKey(0)
    kx, kp, kd0, kd1 = jax.random.split(key, 4)
    x = jax.random.normal(kx, (batch, input_dim), dtype=jnp.float32)
    params = init_params(kp, input_dim, num_units, output_dim)

    # 1) No-dropout pass: check the fused kernel against a plain-JAX reference.
    mu0, sigma0 = dropout_vi_forward(x, params, drop_prob=0.0, key=kd0)
    jax.block_until_ready((mu0, sigma0))
    mu_ref, sigma_ref = _reference_forward_no_dropout(x, params)
    assert mu0.shape == (batch,) and sigma0.shape == (batch,)
    assert bool(jnp.allclose(mu0, mu_ref, rtol=2e-2, atol=2e-2))
    assert bool(jnp.allclose(sigma0, sigma_ref, rtol=2e-2, atol=2e-2))

    # 2) MC-dropout pass (training=True dropout, as in the PyTorch module).
    mu, sigma = dropout_vi_forward(x, params, drop_prob=0.1, key=kd1)
    jax.block_until_ready((mu, sigma))
    assert mu.shape == (batch,) and sigma.shape == (batch,)
    assert bool(jnp.all(jnp.isfinite(mu))) and bool(jnp.all(jnp.isfinite(sigma)))
    assert bool(jnp.all(sigma >= 0.1 - 1e-6))   # sigma = 0.1 + 0.9*softplus(.) >= 0.1

    print("KERNEL_OK")
</pallas_src>

<mosaic_0001>
module attributes {stable_mosaic.version = 11 : i64} {
  func.func @dropout_vi_kernel(%arg0: i32, %arg1: memref<128x128xf32, #tpu.memory_space<vmem>>, %arg2: memref<128x128xf32, #tpu.memory_space<vmem>>, %arg3: memref<128x128xf32, #tpu.memory_space<vmem>>, %arg4: memref<128x128xf32, #tpu.memory_space<vmem>>, %arg5: memref<1x128xf32, #tpu.memory_space<vmem>>, %arg6: memref<128x128xf32, #tpu.memory_space<vmem>>, %arg7: memref<1x128xf32, #tpu.memory_space<vmem>>, %arg8: memref<128x128xf32, #tpu.memory_space<vmem>>, %arg9: memref<1x128xf32, #tpu.memory_space<vmem>>, %arg10: memref<2x128xf32, #tpu.memory_space<vmem>>) attributes {dimension_semantics = [#tpu.dimension_semantics<parallel>], iteration_bounds = array<i64: 1>, scalar_prefetch = 0 : i64, scratch_operands = 0 : i64, tpu.core_type = #tpu.core_type<tc>, window_params = [{transform_indices = @transform_0, window_bounds = array<i64: 128, 128>}, {transform_indices = @transform_1, window_bounds = array<i64: 128, 128>}, {transform_indices = @transform_2, window_bounds = array<i64: 128, 128>}, {pipeline_mode = #tpu.pipeline_mode<synchronous>, transform_indices = @transform_3, window_bounds = array<i64: 128, 128>}, {pipeline_mode = #tpu.pipeline_mode<synchronous>, transform_indices = @transform_4, window_bounds = array<i64: 1, 128>}, {pipeline_mode = #tpu.pipeline_mode<synchronous>, transform_indices = @transform_5, window_bounds = array<i64: 128, 128>}, {pipeline_mode = #tpu.pipeline_mode<synchronous>, transform_indices = @transform_6, window_bounds = array<i64: 1, 128>}, {pipeline_mode = #tpu.pipeline_mode<synchronous>, transform_indices = @transform_7, window_bounds = array<i64: 128, 128>}, {pipeline_mode = #tpu.pipeline_mode<synchronous>, transform_indices = @transform_8, window_bounds = array<i64: 1, 128>}, {transform_indices = @transform_9, window_bounds = array<i64: 2, 128>}]} {
    %c0 = arith.constant 0 : index
    %c0_0 = arith.constant 0 : index
    %0 = vector.load %arg1[%c0, %c0_0] : memref<128x128xf32, #tpu.memory_space<vmem>>, vector<128x128xf32>
    %c0_1 = arith.constant 0 : index
    %c0_2 = arith.constant 0 : index
    %1 = vector.load %arg4[%c0_1, %c0_2] : memref<128x128xf32, #tpu.memory_space<vmem>>, vector<128x128xf32>
    %cst = arith.constant dense<0.000000e+00> : vector<128x128xf32>
    %2 = tpu.matmul %0, %1, %cst {dimension_numbers = #tpu.dot_dimension_numbers<[1], [0], [0], [1], [0, 0, 1, 1], [], []>} : vector<128x128xf32>, vector<128x128xf32>, vector<128x128xf32> -> vector<128x128xf32>
    %c0_3 = arith.constant 0 : index
    %c0_4 = arith.constant 0 : index
    %3 = vector.load %arg5[%c0_3, %c0_4] : memref<1x128xf32, #tpu.memory_space<vmem>>, vector<1x128xf32>
    %4 = vector.broadcast %3 : vector<1x128xf32> to vector<128x128xf32>
    %5 = arith.addf %2, %4 : vector<128x128xf32>
    %cst_5 = arith.constant 0.000000e+00 : f32
    %6 = vector.broadcast %cst_5 : f32 to vector<128x128xf32>
    %7 = arith.maximumf %5, %6 : vector<128x128xf32>
    %c0_6 = arith.constant 0 : index
    %c0_7 = arith.constant 0 : index
    %8 = vector.load %arg2[%c0_6, %c0_7] : memref<128x128xf32, #tpu.memory_space<vmem>>, vector<128x128xf32>
    %9 = arith.mulf %7, %8 : vector<128x128xf32>
    %c0_8 = arith.constant 0 : index
    %c0_9 = arith.constant 0 : index
    %10 = vector.load %arg6[%c0_8, %c0_9] : memref<128x128xf32, #tpu.memory_space<vmem>>, vector<128x128xf32>
    %cst_10 = arith.constant dense<0.000000e+00> : vector<128x128xf32>
    %11 = tpu.matmul %9, %10, %cst_10 {dimension_numbers = #tpu.dot_dimension_numbers<[1], [0], [0], [1], [0, 0, 1, 1], [], []>} : vector<128x128xf32>, vector<128x128xf32>, vector<128x128xf32> -> vector<128x128xf32>
    %c0_11 = arith.constant 0 : index
    %c0_12 = arith.constant 0 : index
    %12 = vector.load %arg7[%c0_11, %c0_12] : memref<1x128xf32, #tpu.memory_space<vmem>>, vector<1x128xf32>
    %13 = vector.broadcast %12 : vector<1x128xf32> to vector<128x128xf32>
    %14 = arith.addf %11, %13 : vector<128x128xf32>
    %cst_13 = arith.constant 0.000000e+00 : f32
    %15 = vector.broadcast %cst_13 : f32 to vector<128x128xf32>
    %16 = arith.maximumf %14, %15 : vector<128x128xf32>
    %c0_14 = arith.constant 0 : index
    %c0_15 = arith.constant 0 : index
    %17 = vector.load %arg3[%c0_14, %c0_15] : memref<128x128xf32, #tpu.memory_space<vmem>>, vector<128x128xf32>
    %18 = arith.mulf %16, %17 : vector<128x128xf32>
    %c0_16 = arith.constant 0 : index
    %c0_17 = arith.constant 0 : index
    %19 = vector.load %arg8[%c0_16, %c0_17] : memref<128x128xf32, #tpu.memory_space<vmem>>, vector<128x128xf32>
    %cst_18 = arith.constant dense<0.000000e+00> : vector<128x128xf32>
    %20 = tpu.matmul %18, %19, %cst_18 {dimension_numbers = #tpu.dot_dimension_numbers<[1], [0], [0], [1], [0, 0, 1, 1], [], []>} : vector<128x128xf32>, vector<128x128xf32>, vector<128x128xf32> -> vector<128x128xf32>
    %c0_19 = arith.constant 0 : index
    %c0_20 = arith.constant 0 : index
    %21 = vector.load %arg9[%c0_19, %c0_20] : memref<1x128xf32, #tpu.memory_space<vmem>>, vector<1x128xf32>
    %22 = vector.broadcast %21 : vector<1x128xf32> to vector<128x128xf32>
    %23 = arith.addf %20, %22 : vector<128x128xf32>
    %24 = tpu.transpose %23, [1, 0] : vector<128x128xf32> -> vector<128x128xf32>
    %25 = vector.extract_strided_slice %24 {offsets = [0, 0], sizes = [1, 128], strides = [1, 1]} : vector<128x128xf32> to vector<1x128xf32>
    %26 = vector.extract_strided_slice %24 {offsets = [1, 0], sizes = [1, 128], strides = [1, 1]} : vector<128x128xf32> to vector<1x128xf32>
    %cst_21 = arith.constant 0.000000e+00 : f32
    %27 = vector.broadcast %cst_21 : f32 to vector<1x128xf32>
    %28 = arith.maximumf %26, %27 : vector<1x128xf32>
    %29 = math.absf %26 : vector<1x128xf32>
    %cst_22 = arith.constant 0.000000e+00 : f32
    %30 = vector.broadcast %cst_22 : f32 to vector<1x128xf32>
    %31 = arith.subf %30, %29 : vector<1x128xf32>
    %32 = math.exp %31 : vector<1x128xf32>
    %33 = math.log1p %32 : vector<1x128xf32>
    %34 = arith.addf %28, %33 : vector<1x128xf32>
    %cst_23 = arith.constant 0.899999976 : f32
    %35 = vector.broadcast %cst_23 : f32 to vector<1x128xf32>
    %36 = arith.mulf %35, %34 : vector<1x128xf32>
    %cst_24 = arith.constant 1.000000e-01 : f32
    %37 = vector.broadcast %cst_24 : f32 to vector<1x128xf32>
    %38 = arith.addf %37, %36 : vector<1x128xf32>
    %39 = tpu.concatenate %25, %38 in 0 : vector<1x128xf32>, vector<1x128xf32> -> vector<2x128xf32>
    %c0_25 = arith.constant 0 : index
    %c0_26 = arith.constant 0 : index
    %40 = vector.load %arg10[%c0_25, %c0_26] : memref<2x128xf32, #tpu.memory_space<vmem>>, vector<2x128xf32>
    tpu.vector_store %arg10[%c0_25, %c0_26], %39 {strides = array<i32>} : memref<2x128xf32, #tpu.memory_space<vmem>>, vector<2x128xf32>,
    return
  }
  func.func @transform_0(%arg0: i32) -> (i32, i32) {
    %c0_i32 = arith.constant 0 : i32
    %c0_i32_0 = arith.constant 0 : i32
    return %arg0, %c0_i32 : i32, i32
  }
  func.func @transform_1(%arg0: i32) -> (i32, i32) {
    %c0_i32 = arith.constant 0 : i32
    %c0_i32_0 = arith.constant 0 : i32
    return %arg0, %c0_i32 : i32, i32
  }
  func.func @transform_2(%arg0: i32) -> (i32, i32) {
    %c0_i32 = arith.constant 0 : i32
    %c0_i32_0 = arith.constant 0 : i32
    return %arg0, %c0_i32 : i32, i32
  }
  func.func @transform_3(%arg0: i32) -> (i32, i32) {
    %c0_i32 = arith.constant 0 : i32
    %c0_i32_0 = arith.constant 0 : i32
    %c0_i32_1 = arith.constant 0 : i32
    return %c0_i32, %c0_i32_0 : i32, i32
  }
  func.func @transform_4(%arg0: i32) -> (i32, i32) {
    %c0_i32 = arith.constant 0 : i32
    %c0_i32_0 = arith.constant 0 : i32
    %c0_i32_1 = arith.constant 0 : i32
    return %c0_i32, %c0_i32_0 : i32, i32
  }
  func.func @transform_5(%arg0: i32) -> (i32, i32) {
    %c0_i32 = arith.constant 0 : i32
    %c0_i32_0 = arith.constant 0 : i32
    %c0_i32_1 = arith.constant 0 : i32
    return %c0_i32, %c0_i32_0 : i32, i32
  }
  func.func @transform_6(%arg0: i32) -> (i32, i32) {
    %c0_i32 = arith.constant 0 : i32
    %c0_i32_0 = arith.constant 0 : i32
    %c0_i32_1 = arith.constant 0 : i32
    return %c0_i32, %c0_i32_0 : i32, i32
  }
  func.func @transform_7(%arg0: i32) -> (i32, i32) {
    %c0_i32 = arith.constant 0 : i32
    %c0_i32_0 = arith.constant 0 : i32
    %c0_i32_1 = arith.constant 0 : i32
    return %c0_i32, %c0_i32_0 : i32, i32
  }
  func.func @transform_8(%arg0: i32) -> (i32, i32) {
    %c0_i32 = arith.constant 0 : i32
    %c0_i32_0 = arith.constant 0 : i32
    %c0_i32_1 = arith.constant 0 : i32
    return %c0_i32, %c0_i32_0 : i32, i32
  }
  func.func @transform_9(%arg0: i32) -> (i32, i32) {
    %c0_i32 = arith.constant 0 : i32
    %c0_i32_0 = arith.constant 0 : i32
    return %c0_i32, %arg0 : i32, i32
  }
}

</mosaic_0001>

<bundles_post_ra>
// kernel: tpu_custom_call.1
= control target key start
LH: loop header
LB: loop body
LE: loop exit
PB: predicated region body
PF: predicated region fallthrough
CT: control target
= control target key end

     0   :  { %14 = vsyncpa [#allocation3], 0  ;;  %s1614_s0 = inlined_call_operand.hbm [shape: f32[128,128], index: 0, kind: input, shape index: {}]   ;;  %s1615_s1 = inlined_call_operand.hbm [shape: f32[128,128], index: 1, kind: input, shape index: {}]   ;;  %s1616_s2 = inlined_call_operand.hbm [shape: f32[128,128], index: 2, kind: input, shape index: {}]   ;;  %s1617_s3 = inlined_call_operand.hbm [shape: f32[128,128], index: 3, kind: input, shape index: {}]   ;;  %s1618_s4 = inlined_call_operand.vmem [shape: f32[1,128], index: 4, kind: input, shape index: {}]   ;;  %s1619_s5 = inlined_call_operand.hbm [shape: f32[128,128], index: 5, kind: input, shape index: {}]   ;;  %s1620_s6 = inlined_call_operand.vmem [shape: f32[1,128], index: 6, kind: input, shape index: {}]   ;;  %s1621_s7 = inlined_call_operand.hbm [shape: f32[128,128], index: 7, kind: input, shape index: {}]   ;;  %s1622_s8 = inlined_call_operand.vmem [shape: f32[1,128], index: 8, kind: input, shape index: {}]   ;;  %s1623_s9 = inlined_call_operand.hbm [shape: f32[2,128], index: 9, kind: output, shape index: {}]  }
   0x1   :  { %15 = vsyncpa [#allocation6], 0 }
   0x2   :  { %16 = vsyncpa [#allocation9], 0 }
   0x3   :  { %17 = vsyncpa [#allocation12], 0 }
   0x4   :  { %18 = vsyncpa [#allocation4], 0  ;;  %s1357_s30 = smov [#allocation5]   ;;  %s1358_s11 = smov [#allocation8]  }
   0x5   :  { %s36_s10 = sshll.u32 %s1357_s30, 4  ;;  %s60_s12 = sshll.u32 %s1358_s11, 4  ;;  %s37_s10 = int_to_ptr.vmem [resolvable:$true] %s36_s10  ;;  %s1416_s12 = int_to_ptr.vmem [resolvable:$true] %s60_s12 }
   0x6   :  { %s1193_s15 = scalar_lea.hbm %s1615_s1, 2048 }
   0x7   :  { %p1194_p0 = scmp.ne.s32.totalorder %s1615_s1, %s1193_s15  ;;  %p1197_p1 = scmp.lt.u32.totalorder %s1193_s15, %s1615_s1 }
   0x9   :  { %p1199_p2 = pnand %p1197_p1, %p1194_p0 }
   0xb   :  { %1202 = shalt.err (!%p1199_p2)
}
   0xc   :  { %s1203_s20 = scalar_lea.vmem %s37_s10, 2048  ;;  %p1208_p4 = scmp.lt.s32.totalorder %s37_s10, %s37_s10 }
   0xd   :  { %p1204_p3 = scmp.ne.s32.totalorder %s37_s10, %s1203_s20  ;;  %p1209_p5 = scmp.lt.s32.totalorder %s1203_s20, %s1203_s20 }
   0xf   :  { %p1210_p6 = por %p1209_p5, %p1208_p4 }
  0x11   :  { %p1211_p7 = pnand %p1210_p6, %p1204_p3 }
  0x13   :  { %1214 = shalt.err (!%p1211_p7)
}
  0x14   :  { %s1359_s21 = smov 128   ;;  %s1360_s22 = smov 8  }
  0x15   :  { %42 = dma.hbm_to_vmem [thread:$0]  %s1615_s1, 2048, %s37_s10, [#allocation6], %s1359_s21, %s1359_s21, %s1360_s22  }
  0x16   :  { %s1215_s27 = scalar_lea.hbm %s1617_s3, 2048 }
  0x17   :  { %p1216_p8 = scmp.ne.s32.totalorder %s1617_s3, %s1215_s27  ;;  %p1219_p9 = scmp.lt.u32.totalorder %s1215_s27, %s1617_s3 }
  0x19   :  { %p1221_p10 = pnand %p1219_p9, %p1216_p8 }
  0x1b   :  { %1224 = shalt.err (!%p1221_p10)
}
  0x1c   :  { %s1225_s13 = scalar_lea.vmem %s1416_s12, 2048  ;;  %p1230_p12 = scmp.lt.s32.totalorder %s1416_s12, %s1416_s12 }
  0x1d   :  { %p1226_p11 = scmp.ne.s32.totalorder %s1416_s12, %s1225_s13  ;;  %p1231_p13 = scmp.lt.s32.totalorder %s1225_s13, %s1225_s13 }
  0x1f   :  { %p1232_p0 = por %p1231_p13, %p1230_p12 }
  0x21   :  { %p1233_p1 = pnand %p1232_p0, %p1226_p11 }
  0x23   :  { %1236 = shalt.err (!%p1233_p1)
}
  0x24   :  { %66 = dma.hbm_to_vmem [thread:$0]  %s1617_s3, 2048, %s1416_s12, [#allocation9], %s1359_s21, %s1359_s21, %s1360_s22  }
  0x25   :  { %s1361_s14 = smov [#allocation2]   ;;  %s1362_s16 = smov [#allocation7]  }
  0x26   :  { %s24_s15 = sshll.u32 %s1361_s14, 4  ;;  %s48_s17 = sshll.u32 %s1362_s16, 4  ;;  %s25_s15 = int_to_ptr.vmem [resolvable:$true] %s24_s15  ;;  %s1453_s17 = int_to_ptr.vmem [resolvable:$true] %s48_s17 }
  0x27   :  { %s1237_s20 = scalar_lea.hbm %s1614_s0, 2048 }
  0x28   :  { %p1238_p2 = scmp.ne.s32.totalorder %s1614_s0, %s1237_s20  ;;  %p1241_p3 = scmp.lt.u32.totalorder %s1237_s20, %s1614_s0 }
  0x2a   :  { %p1243_p4 = pnand %p1241_p3, %p1238_p2 }
  0x2c   :  { %1246 = shalt.err (!%p1243_p4)
}
  0x2d   :  { %s1247_s3 = scalar_lea.vmem %s25_s15, 2048  ;;  %p1252_p6 = scmp.lt.s32.totalorder %s25_s15, %s25_s15 }
  0x2e   :  { %p1248_p5 = scmp.ne.s32.totalorder %s25_s15, %s1247_s3  ;;  %p1253_p7 = scmp.lt.s32.totalorder %s1247_s3, %s1247_s3 }
  0x30   :  { %p1254_p8 = por %p1253_p7, %p1252_p6 }
  0x32   :  { %p1255_p9 = pnand %p1254_p8, %p1248_p5 }
  0x34   :  { %1258 = shalt.err (!%p1255_p9)
}
  0x35   :  { %30 = dma.hbm_to_vmem [thread:$0]  %s1614_s0, 2048, %s25_s15, [#allocation3], %s1359_s21, %s1359_s21, %s1360_s22  }
  0x36   :  { %s1259_s30 = scalar_lea.hbm %s1616_s2, 2048 }
  0x37   :  { %p1260_p10 = scmp.ne.s32.totalorder %s1616_s2, %s1259_s30  ;;  %p1263_p11 = scmp.lt.u32.totalorder %s1259_s30, %s1616_s2 }
  0x39   :  { %p1265_p12 = pnand %p1263_p11, %p1260_p10 }
  0x3b   :  { %1268 = shalt.err (!%p1265_p12)
}
  0x3c   :  { %s1269_s14 = scalar_lea.vmem %s1453_s17, 2048  ;;  %p1274_p0 = scmp.lt.s32.totalorder %s1453_s17, %s1453_s17 }
  0x3d   :  { %p1270_p13 = scmp.ne.s32.totalorder %s1453_s17, %s1269_s14  ;;  %p1275_p1 = scmp.lt.s32.totalorder %s1269_s14, %s1269_s14 }
  0x3f   :  { %p1276_p2 = por %p1275_p1, %p1274_p0 }
  0x41   :  { %p1277_p3 = pnand %p1276_p2, %p1270_p13 }
  0x43   :  { %1280 = shalt.err (!%p1277_p3)
}
  0x44   :  { %54 = dma.hbm_to_vmem [thread:$0]  %s1616_s2, 2048, %s1453_s17, [#allocation6], %s1359_s21, %s1359_s21, %s1360_s22  }
  0x45   :  { %s1363_s16 = smov [#allocation10]   ;;  %s1364_s19 = smov [#allocation11]  }
  0x46   :  { %s74_s18 = sshll.u32 %s1363_s16, 4  ;;  %s88_s20 = sshll.u32 %s1364_s19, 4  ;;  %s75_s18 = int_to_ptr.vmem [resolvable:$true] %s74_s18  ;;  %s1490_s20 = int_to_ptr.vmem [resolvable:$true] %s88_s20 }
  0x47   :  { %s1281_s25 = scalar_lea.hbm %s1619_s5, 2048 }
  0x48   :  { %p1282_p4 = scmp.ne.s32.totalorder %s1619_s5, %s1281_s25  ;;  %p1285_p5 = scmp.lt.u32.totalorder %s1281_s25, %s1619_s5 }
  0x4a   :  { %p1287_p6 = pnand %p1285_p5, %p1282_p4 }
  0x4c   :  { %1290 = shalt.err (!%p1287_p6)
}
  0x4d   :  { %s1291_s2 = scalar_lea.vmem %s75_s18, 2048  ;;  %p1296_p8 = scmp.lt.s32.totalorder %s75_s18, %s75_s18 }
  0x4e   :  { %p1292_p7 = scmp.ne.s32.totalorder %s75_s18, %s1291_s2  ;;  %p1297_p9 = scmp.lt.s32.totalorder %s1291_s2, %s1291_s2 }
  0x50   :  { %p1298_p10 = por %p1297_p9, %p1296_p8 }
  0x52   :  { %p1299_p11 = pnand %p1298_p10, %p1292_p7 }
  0x54   :  { %1302 = shalt.err (!%p1299_p11)
}
  0x55   :  { %80 = dma.hbm_to_vmem [thread:$0]  %s1619_s5, 2048, %s75_s18, [#allocation9], %s1359_s21, %s1359_s21, %s1360_s22  }
  0x56   :  { %s1303_s11 = scalar_lea.hbm %s1621_s7, 2048 }
  0x57   :  { %p1304_p12 = scmp.ne.s32.totalorder %s1621_s7, %s1303_s11  ;;  %p1307_p13 = scmp.lt.u32.totalorder %s1303_s11, %s1621_s7 }
  0x59   :  { %p1309_p0 = pnand %p1307_p13, %p1304_p12 }
  0x5b   :  { %1312 = shalt.err (!%p1309_p0)
}
  0x5c   :  { %s1313_s0 = scalar_lea.vmem %s1490_s20, 2048  ;;  %p1318_p2 = scmp.lt.s32.totalorder %s1490_s20, %s1490_s20 }
  0x5d   :  { %p1314_p1 = scmp.ne.s32.totalorder %s1490_s20, %s1313_s0  ;;  %p1319_p3 = scmp.lt.s32.totalorder %s1313_s0, %s1313_s0 }
  0x5f   :  { %p1320_p4 = por %p1319_p3, %p1318_p2 }
  0x61   :  { %p1321_p5 = pnand %p1320_p4, %p1314_p1 }
  0x63   :  { %1324 = shalt.err (!%p1321_p5)
}
  0x64   :  { %94 = dma.hbm_to_vmem [thread:$0]  %s1621_s7, 2048, %s1490_s20, [#allocation12], %s1359_s21, %s1359_s21, %s1360_s22  }
  0x65   :  { %1347 = dma.done.wait [#allocation3], 2048  }
  0x66   :  { %1348 = vsyncadd [#allocation3], 4294965248 }
  0x67   :  { %1349 = dma.done.wait [#allocation6], 4096  }
  0x68   :  { %1350 = vsyncadd [#allocation6], 4294963200 }
  0x69   :  { %1351 = dma.done.wait [#allocation9], 4096  }
  0x6a   :  { %1352 = vsyncadd [#allocation9], 4294963200 }
  0x6b   :  { %1353 = dma.done.wait [#allocation12], 2048  }
  0x6c   :  { %1354 = vsyncadd [#allocation12], 4294965248  ;;  %v131_v0 = vld [vmem:[#allocation8] sm:$0xff]  ;;  %v132_v1 = vld [vmem:[#allocation8 + $0x8] sm:$0xff]  ;;  %vm780_vm1 = vcmask 1040384  }
  0x6d   :  { %v133_v2 = vld [vmem:[#allocation8 + $0x10] sm:$0xff]  ;;  %v1068_v3 = vpack.c.bf16 %v132_v1, %v131_v0  ;;  %v134_v4 = vld [vmem:[#allocation8 + $0x18] sm:$0xff]  ;;  %v135_v6 = vld [vmem:[#allocation8 + $0x20] sm:$0xff] }
  0x6e   :  { %v1072_v5 = vpack.c.bf16 %v134_v4, %v133_v2  ;;  %v136_v7 = vld [vmem:[#allocation8 + $0x28] sm:$0xff]  ;;  %v115_v9 = vld [vmem:[#allocation2] sm:$0xff]  ;;  %v137_v10 = vld [vmem:[#allocation8 + $0x30] sm:$0xff] }
  0x6f   :  { %1069 = vmatprep.subr.bf16.mxu0 %v1068_v3  ;;  %v1076_v8 = vpack.c.bf16 %v136_v7, %v135_v6  ;;  %v138_v11 = vld [vmem:[#allocation8 + $0x38] sm:$0xff]  ;;  %932 = vmatprep.mubr.f32.mxu0 %v115_v9  ;;  %v139_v13 = vld [vmem:[#allocation8 + $0x40] sm:$0xff]  ;;  %v140_v14 = vld [vmem:[#allocation8 + $0x48] sm:$0xff] }
  0x70   :  { %1071 = vmatpush3.bf16.msra.mxu0 %v1068_v3  ;;  %v1080_v12 = vpack.c.bf16 %v138_v11, %v137_v10  ;;  %v347_v15 = vld [vmem:[#allocation10] sm:$0xff]  ;;  %v348_v16 = vld [vmem:[#allocation10 + $0x8] sm:$0xff]  ;;  %v349_v17 = vld [vmem:[#allocation10 + $0x10] sm:$0xff]  ;;  %v1084_v21 = vpack.c.bf16 %v140_v14, %v139_v13 }
  0x71   :  { %1073 = vmatprep.subr.bf16.mxu0 %v1072_v5  ;;  %v350_v18 = vld [vmem:[#allocation10 + $0x18] sm:$0xff]  ;;  %v1100_v19 = vpack.c.bf16 %v348_v16, %v347_v15  ;;  %v351_v22 = vld [vmem:[#allocation10 + $0x20] sm:$0xff]  ;;  %v352_v23 = vld [vmem:[#allocation10 + $0x28] sm:$0xff] }
  0x72   :  { %v1104_v20 = vpack.c.bf16 %v350_v18, %v349_v17  ;;  %v141_v24 = vld [vmem:[#allocation8 + $0x50] sm:$0xff]  ;;  %v142_v25 = vld [vmem:[#allocation8 + $0x58] sm:$0xff]  ;;  %v1108_v26 = vpack.c.bf16 %v352_v23, %v351_v22  ;;  %v143_v30 = vld [vmem:[#allocation8 + $0x60] sm:$0xff] }
  0x73   :  { %1101 = vmatprep.subr.bf16.mxu1 %v1100_v19  ;;  %v1088_v27 = vpack.c.bf16 %v142_v25, %v141_v24  ;;  %v353_v28 = vld [vmem:[#allocation10 + $0x30] sm:$0xff]  ;;  %v354_v29 = vld [vmem:[#allocation10 + $0x38] sm:$0xff]  ;;  %v144_v31 = vld [vmem:[#allocation8 + $0x68] sm:$0xff] }
  0x74   :  { %1075 = vmatpush3.bf16.msra.mxu0 %v1072_v5  ;;  %1103 = vmatpush3.bf16.msra.mxu1 %v1100_v19  ;;  %v1112_v32 = vpack.c.bf16 %v354_v29, %v353_v28  ;;  %v1092_v33 = vpack.c.bf16 %v144_v31, %v143_v30  ;;  %v355_v34 = vld [vmem:[#allocation10 + $0x40] sm:$0xff]  ;;  %v356_v35 = vld [vmem:[#allocation10 + $0x48] sm:$0xff]  ;;  %v145_v36 = vld [vmem:[#allocation8 + $0x70] sm:$0xff] }
  0x75   :  { %1077 = vmatprep.subr.bf16.mxu0 %v1076_v8  ;;  %1105 = vmatprep.subr.bf16.mxu1 %v1104_v20  ;;  %v146_v37 = vld [vmem:[#allocation8 + $0x78] sm:$0xff]  ;;  %v1116_v38 = vpack.c.bf16 %v356_v35, %v355_v34  ;;  %v357_v40 = vld [vmem:[#allocation10 + $0x50] sm:$0xff]  ;;  %v116_v43 = vld [vmem:[#allocation2 + $0x8] sm:$0xff] }
  0x76   :  { %v1096_v39 = vpack.c.bf16 %v146_v37, %v145_v36  ;;  %v358_v41 = vld [vmem:[#allocation10 + $0x58] sm:$0xff]  ;;  %v117_v44 = vld [vmem:[#allocation2 + $0x10] sm:$0xff]  ;;  %v119_v46 = vld [vmem:[#allocation2 + $0x20] sm:$0xff] }
  0x77   :  { %v1120_v42 = vpack.c.bf16 %v358_v41, %v357_v40  ;;  %v118_v45 = vld [vmem:[#allocation2 + $0x18] sm:$0xff]  ;;  %v120_v47 = vld [vmem:[#allocation2 + $0x28] sm:$0xff]  ;;  %v121_v48 = vld [vmem:[#allocation2 + $0x30] sm:$0xff] }
  0x78   :  { %1079 = vmatpush3.bf16.msra.mxu0 %v1076_v8  ;;  %1107 = vmatpush3.bf16.msra.mxu1 %v1104_v20  ;;  %v122_v49 = vld [vmem:[#allocation2 + $0x38] sm:$0xff]  ;;  %v123_v50 = vld [vmem:[#allocation2 + $0x40] sm:$0xff]  ;;  %v124_v51 = vld [vmem:[#allocation2 + $0x48] sm:$0xff] }
  0x79   :  { %1081 = vmatprep.subr.bf16.mxu0 %v1080_v12  ;;  %1109 = vmatprep.subr.bf16.mxu1 %v1108_v26  ;;  %v125_v52 = vld [vmem:[#allocation2 + $0x50] sm:$0xff]  ;;  %v126_v53 = vld [vmem:[#allocation2 + $0x58] sm:$0xff]  ;;  %v127_v54 = vld [vmem:[#allocation2 + $0x60] sm:$0xff] }
  0x7a   :  { %v128_v55 = vld [vmem:[#allocation2 + $0x68] sm:$0xff]  ;;  %v129_v56 = vld [vmem:[#allocation2 + $0x70] sm:$0xff]  ;;  %v130_v57 = vld [vmem:[#allocation2 + $0x78] sm:$0xff] }
  0x7b   :  { %v359_v58 = vld [vmem:[#allocation10 + $0x60] sm:$0xff]  ;;  %v360_v59 = vld [vmem:[#allocation10 + $0x68] sm:$0xff]  ;;  %v361_v61 = vld [vmem:[#allocation10 + $0x70] sm:$0xff] }
  0x7c   :  { %1083 = vmatpush3.bf16.msra.mxu0 %v1080_v12  ;;  %1111 = vmatpush3.bf16.msra.mxu1 %v1108_v26  ;;  %v1124_v60 = vpack.c.bf16 %v360_v59, %v359_v58  ;;  %v362_v62 = vld [vmem:[#allocation10 + $0x78] sm:$0xff]  ;;  %v563_v0 = vld [vmem:[#allocation11] sm:$0xff]  ;;  %v564_v1 = vld [vmem:[#allocation11 + $0x8] sm:$0xff] }
  0x7d   :  { %1085 = vmatprep.subr.bf16.mxu0 %v1084_v21  ;;  %1113 = vmatprep.subr.bf16.mxu1 %v1112_v32  ;;  %v1128_v63 = vpack.c.bf16 %v362_v62, %v361_v61  ;;  %v565_v2 = vld [vmem:[#allocation11 + $0x10] sm:$0xff]  ;;  %v1132_v3 = vpack.c.bf16 %v564_v1, %v563_v0  ;;  %v566_v4 = vld [vmem:[#allocation11 + $0x18] sm:$0xff]  ;;  %v567_v6 = vld [vmem:[#allocation11 + $0x20] sm:$0xff] }
  0x7e   :  { %v1527_v5 = vpack.c.bf16 %v566_v4, %v565_v2  ;;  %v568_v7 = vld [vmem:[#allocation11 + $0x28] sm:$0xff]  ;;  %v569_v9 = vld [vmem:[#allocation11 + $0x30] sm:$0xff]  ;;  %v570_v10 = vld [vmem:[#allocation11 + $0x38] sm:$0xff] }
  0x7f   :  { %v1530_v8 = vpack.c.bf16 %v568_v7, %v567_v6  ;;  %v1534_v11 = vpack.c.bf16 %v570_v10, %v569_v9  ;;  %v571_v12 = vld [vmem:[#allocation11 + $0x40] sm:$0xff]  ;;  %v572_v13 = vld [vmem:[#allocation11 + $0x48] sm:$0xff]  ;;  %v573_v15 = vld [vmem:[#allocation11 + $0x50] sm:$0xff] }
  0x80   :  { %1087 = vmatpush3.bf16.msra.mxu0 %v1084_v21  ;;  %1115 = vmatpush3.bf16.msra.mxu1 %v1112_v32  ;;  %v1538_v14 = vpack.c.bf16 %v572_v13, %v571_v12  ;;  %v574_v16 = vld [vmem:[#allocation11 + $0x58] sm:$0xff]  ;;  %v1550_v18 = vld [vmem:[%s1618_s4] ss:$0 sm:$0xff]  ;;  %v316_v25 = vld [vmem:[#allocation5 + $0x8] sm:$0xff] }
  0x81   :  { %1089 = vmatprep.subr.bf16.mxu0 %v1088_v27  ;;  %1117 = vmatprep.subr.bf16.mxu1 %v1116_v38  ;;  %v1542_v17 = vpack.c.bf16 %v574_v16, %v573_v15  ;;  %v315_v24 = vld [vmem:[#allocation5] sm:$0xff]  ;;  %v318_v30 = vld [vmem:[#allocation5 + $0x18] sm:$0xff]  ;;  %v317_v35 = vld [vmem:[#allocation5 + $0x10] sm:$0xff] }
  0x82   :  { %v324_v62 = vld [vmem:[#allocation5 + $0x48] sm:$0xff]  ;;  %v323_v1 = vld [vmem:[#allocation5 + $0x40] sm:$0xff]  ;;  %v326_v9 = vld [vmem:[#allocation5 + $0x58] sm:$0xff] }
  0x84   :  { %1091 = vmatpush3.bf16.msra.mxu0 %v1088_v27  ;;  %1119 = vmatpush3.bf16.msra.mxu1 %v1116_v38 }
  0x85   :  { %1093 = vmatprep.subr.bf16.mxu0 %v1092_v33  ;;  %1121 = vmatprep.subr.bf16.mxu1 %v1120_v42 }
  0x88   :  { %1095 = vmatpush3.bf16.msra.mxu0 %v1092_v33  ;;  %1123 = vmatpush3.bf16.msra.mxu1 %v1120_v42  ;;  %v320_v42 = vld [vmem:[#allocation5 + $0x28] sm:$0xff] }
  0x89   :  { %1097 = vmatprep.subr.bf16.mxu0 %v1096_v39  ;;  %1125 = vmatprep.subr.bf16.mxu1 %v1124_v60 }
  0x8c   :  { %1099 = vmatpush3.bf16.msra.mxu0 %v1096_v39  ;;  %1127 = vmatpush3.bf16.msra.mxu1 %v1124_v60 }
  0x8d   :  { %1129 = vmatprep.subr.bf16.mxu1 %v1128_v63  ;;  %1133 = vmatprep.subr.bf16.mxu0 %v1132_v3 }
  0x8f   :  { %933 = vmatmul.mubr.f32.vlgmr.msra.gmra.mrb[0].mxu0 %v116_v43 }
  0x90   :  { %935 = vmatprep.mubr.f32.mxu0 %v117_v44  ;;  %1131 = vmatpush3.bf16.msra.mxu1 %v1128_v63 }
  0x91   :  { %1164 = vmatprep.subr.bf16.mxu1 %v1132_v3  ;;  %1135 = vmatpush3.bf16.msra.mxu0 %v1132_v3 }
  0x92   :  { %1137 = vmatprep.subr.bf16.mxu0 %v1527_v5 }
  0x93   :  { %936 = vmatmul.mubr.f32.gmra.mrb[2].mxu0 %v118_v45  ;;  %v319_v45 = vld [vmem:[#allocation5 + $0x20] sm:$0xff] }
  0x94   :  { %938 = vmatprep.mubr.f32.mxu0 %v119_v46 }
  0x95   :  { %1139 = vmatpush3.bf16.msra.mxu0 %v1527_v5 }
  0x96   :  { %1141 = vmatprep.subr.bf16.mxu0 %v1530_v8 }
  0x97   :  { %939 = vmatmul.mubr.f32.gmra.mrb[4].mxu0 %v120_v47 }
  0x98   :  { %941 = vmatprep.mubr.f32.mxu0 %v121_v48 }
  0x99   :  { %1143 = vmatpush3.bf16.msra.mxu0 %v1530_v8 }
  0x9a   :  { %1145 = vmatprep.subr.bf16.mxu0 %v1534_v11 }
  0x9b   :  { %942 = vmatmul.mubr.f32.gmra.mrb[6].mxu0 %v122_v49 }
  0x9c   :  { %944 = vmatprep.mubr.f32.mxu0 %v123_v50 }
  0x9d   :  { %1147 = vmatpush3.bf16.msra.mxu0 %v1534_v11 }
  0x9e   :  { %1149 = vmatprep.subr.bf16.mxu0 %v1538_v14 }
  0x9f   :  { %945 = vmatmul.mubr.f32.gmra.mrb[8].mxu0 %v124_v51 }
  0xa0   :  { %947 = vmatprep.mubr.f32.mxu0 %v125_v52  ;;  %v322_v52 = vld [vmem:[#allocation5 + $0x38] sm:$0xff] }
  0xa1   :  { %1151 = vmatpush3.bf16.msra.mxu0 %v1538_v14 }
  0xa2   :  { %1153 = vmatprep.subr.bf16.mxu0 %v1542_v17 }
  0xa3   :  { %948 = vmatmul.mubr.f32.gmra.mrb[10].mxu0 %v126_v53 }
  0xa4   :  { %950 = vmatprep.mubr.f32.mxu0 %v127_v54 }
  0xa5   :  { %1155 = vmatpush3.bf16.msra.mxu0 %v1542_v17 }
  0xa7   :  { %951 = vmatmul.mubr.f32.gmra.mrb[12].mxu0 %v128_v55  ;;  %v321_v55 = vld [vmem:[#allocation5 + $0x30] sm:$0xff] }
  0xa8   :  { %953 = vmatprep.mubr.f32.mxu0 %v129_v56 }
  0xab   :  { %954 = vmatmul.mubr.f32.gmra.mrb[14].mxu0 %v130_v57 }
 0x162   :  { %v934_v19 = vpop.f32.mrb[0].mxu0 }
 0x163   :  { %v226_v20 = vadd.f32 %v934_v19, %v1550_v18  ;;  %v220_v21 = vpop.f32.mrb[1].mxu0 }
 0x164   :  { %v221_v22 = vadd.f32 %v1550_v18, %v220_v21 }
 0x165   :  { %v300_v23 = vmax.f32 %v226_v20, 0.0 }
 0x166   :  { %v299_v26 = vmax.f32 %v221_v22, 0.0  ;;  %v937_v27 = vpop.f32.mrb[2].mxu0  ;;  %v328_v22 = vld [vmem:[#allocation5 + $0x68] sm:$0xff] }
 0x167   :  { %v236_v28 = vadd.f32 %v937_v27, %v1550_v18  ;;  %v230_v29 = vpop.f32.mrb[3].mxu0  ;;  %v332_v33 = vmul.f32 %v316_v25, %v300_v23 }
 0x168   :  { %v231_v31 = vadd.f32 %v1550_v18, %v230_v29  ;;  %v331_v32 = vmul.f32 %v315_v24, %v299_v26 }
 0x169   :  { %v302_v34 = vmax.f32 %v236_v28, 0.0 }
 0x16a   :  { %v301_v36 = vmax.f32 %v231_v31, 0.0  ;;  %988 = vmatprep.mubr.f32.mxu1 %v331_v32  ;;  %v940_v37 = vpop.f32.mrb[4].mxu0  ;;  %v330_v31 = vld [vmem:[#allocation5 + $0x78] sm:$0xff] }
 0x16b   :  { %v334_v38 = vmul.f32 %v318_v30, %v302_v34  ;;  %989 = vmatmul.mubr.f32.vlgmr.msra.gmra.mrb[0].mxu1 %v332_v33  ;;  %v246_v39 = vadd.f32 %v940_v37, %v1550_v18  ;;  %v240_v40 = vpop.f32.mrb[5].mxu0  ;;  %v575_v37 = vld [vmem:[#allocation11 + $0x60] sm:$0xff] }
 0x16c   :  { %v333_v41 = vmul.f32 %v317_v35, %v301_v36  ;;  %v241_v43 = vadd.f32 %v1550_v18, %v240_v40  ;;  %1172 = vmatpush3.bf16.msra.mxu1 %v1132_v3  ;;  %v577_v40 = vld [vmem:[#allocation11 + $0x70] sm:$0xff] }
 0x16d   :  { %v304_v44 = vmax.f32 %v246_v39, 0.0  ;;  %1165 = vmatprep.subr.bf16.mxu1 %v1527_v5 }
 0x16e   :  { %v303_v46 = vmax.f32 %v241_v43, 0.0  ;;  %991 = vmatprep.mubr.f32.mxu1 %v333_v41  ;;  %v943_v47 = vpop.f32.mrb[6].mxu0  ;;  %v578_v41 = vld [vmem:[#allocation11 + $0x78] sm:$0xff] }
 0x16f   :  { %v336_v48 = vmul.f32 %v320_v42, %v304_v44  ;;  %992 = vmatmul.mubr.f32.gmra.mrb[2].mxu1 %v334_v38  ;;  %v256_v49 = vadd.f32 %v943_v47, %v1550_v18  ;;  %v250_v50 = vpop.f32.mrb[7].mxu0  ;;  %v576_v38 = vld [vmem:[#allocation11 + $0x68] sm:$0xff]  ;;  %v531_v47 = vld [vmem:[#allocation7] sm:$0xff] }
 0x170   :  { %v335_v51 = vmul.f32 %v319_v45, %v303_v46  ;;  %v251_v53 = vadd.f32 %v1550_v18, %v250_v50  ;;  %1173 = vmatpush3.bf16.msra.mxu1 %v1527_v5  ;;  %v1156_v39 = vpack.c.bf16 %v576_v38, %v575_v37 }
 0x171   :  { %v306_v54 = vmax.f32 %v256_v49, 0.0  ;;  %1166 = vmatprep.subr.bf16.mxu1 %v1530_v8 }
 0x172   :  { %994 = vmatprep.mubr.f32.mxu1 %v335_v51  ;;  %v305_v56 = vmax.f32 %v251_v53, 0.0  ;;  %v946_v57 = vpop.f32.mrb[8].mxu0  ;;  %1157 = vmatprep.subr.bf16.mxu0 %v1156_v39 }
 0x173   :  { %v338_v58 = vmul.f32 %v322_v52, %v306_v54  ;;  %995 = vmatmul.mubr.f32.gmra.mrb[4].mxu1 %v336_v48  ;;  %v266_v59 = vadd.f32 %v946_v57, %v1550_v18  ;;  %v260_v60 = vpop.f32.mrb[9].mxu0  ;;  %1159 = vmatpush3.bf16.msra.mxu0 %v1156_v39  ;;  %v532_v48 = vld [vmem:[#allocation7 + $0x8] sm:$0xff]  ;;  %v534_v54 = vld [vmem:[#allocation7 + $0x18] sm:$0xff] }
 0x174   :  { %v337_v61 = vmul.f32 %v321_v55, %v305_v56  ;;  %v261_v63 = vadd.f32 %v1550_v18, %v260_v60  ;;  %1174 = vmatpush3.bf16.msra.mxu1 %v1530_v8  ;;  %v325_v8 = vld [vmem:[#allocation5 + $0x50] sm:$0xff] }
 0x175   :  { %v308_v0 = vmax.f32 %v266_v59, 0.0  ;;  %1167 = vmatprep.subr.bf16.mxu1 %v1534_v11 }
 0x176   :  { %997 = vmatprep.mubr.f32.mxu1 %v337_v61  ;;  %v307_v2 = vmax.f32 %v261_v63, 0.0  ;;  %v949_v3 = vpop.f32.mrb[10].mxu0 }
 0x177   :  { %v340_v4 = vmul.f32 %v324_v62, %v308_v0  ;;  %998 = vmatmul.mubr.f32.gmra.mrb[6].mxu1 %v338_v58  ;;  %v276_v5 = vadd.f32 %v949_v3, %v1550_v18  ;;  %v270_v6 = vpop.f32.mrb[11].mxu0  ;;  %v533_v58 = vld [vmem:[#allocation7 + $0x10] sm:$0xff] }
 0x178   :  { %v339_v7 = vmul.f32 %v323_v1, %v307_v2  ;;  %v271_v10 = vadd.f32 %v1550_v18, %v270_v6  ;;  %1175 = vmatpush3.bf16.msra.mxu1 %v1534_v11  ;;  %v327_v11 = vld [vmem:[#allocation5 + $0x60] sm:$0xff]  ;;  %v536_v1 = vld [vmem:[#allocation7 + $0x28] sm:$0xff] }
 0x179   :  { %v310_v12 = vmax.f32 %v276_v5, 0.0  ;;  %1168 = vmatprep.subr.bf16.mxu1 %v1538_v14 }
 0x17a   :  { %1000 = vmatprep.mubr.f32.mxu1 %v339_v7  ;;  %v309_v13 = vmax.f32 %v271_v10, 0.0  ;;  %v952_v15 = vpop.f32.mrb[12].mxu0 }
 0x17b   :  { %v342_v16 = vmul.f32 %v326_v9, %v310_v12  ;;  %1001 = vmatmul.mubr.f32.gmra.mrb[8].mxu1 %v340_v4  ;;  %v286_v19 = vadd.f32 %v952_v15, %v1550_v18  ;;  %v280_v20 = vpop.f32.mrb[13].mxu0  ;;  %v535_v4 = vld [vmem:[#allocation7 + $0x20] sm:$0xff] }
 0x17c   :  { %v341_v21 = vmul.f32 %v325_v8, %v309_v13  ;;  %v281_v23 = vadd.f32 %v1550_v18, %v280_v20  ;;  %1176 = vmatpush3.bf16.msra.mxu1 %v1538_v14  ;;  %v329_v14 = vld [vmem:[#allocation5 + $0x70] sm:$0xff]  ;;  %v538_v8 = vld [vmem:[#allocation7 + $0x38] sm:$0xff] }
 0x17d   :  { %v312_v24 = vmax.f32 %v286_v19, 0.0  ;;  %1169 = vmatprep.subr.bf16.mxu1 %v1542_v17 }
 0x17e   :  { %1003 = vmatprep.mubr.f32.mxu1 %v341_v21  ;;  %v311_v25 = vmax.f32 %v281_v23, 0.0  ;;  %v955_v26 = vpop.f32.mrb[14].mxu0 }
 0x17f   :  { %v344_v27 = vmul.f32 %v328_v22, %v312_v24  ;;  %1004 = vmatmul.mubr.f32.gmra.mrb[10].mxu1 %v342_v16  ;;  %v296_v28 = vadd.f32 %v955_v26, %v1550_v18  ;;  %v290_v29 = vpop.f32.mrb[15].mxu0  ;;  %v537_v16 = vld [vmem:[#allocation7 + $0x30] sm:$0xff] }
 0x180   :  { %v343_v30 = vmul.f32 %v327_v11, %v311_v25  ;;  %v291_v32 = vadd.f32 %v1550_v18, %v290_v29  ;;  %1177 = vmatpush3.bf16.msra.mxu1 %v1542_v17  ;;  %v1160_v18 = vpack.c.bf16 %v578_v41, %v577_v40  ;;  %v1581_v17 = vld [vmem:[%s1620_s6] ss:$0 sm:$0xff]  ;;  %v540_v11 = vld [vmem:[#allocation7 + $0x48] sm:$0xff] }
 0x181   :  { %v314_v33 = vmax.f32 %v296_v28, 0.0  ;;  %1170 = vmatprep.subr.bf16.mxu1 %v1156_v39 }
 0x182   :  { %1006 = vmatprep.mubr.f32.mxu1 %v343_v30  ;;  %v313_v34 = vmax.f32 %v291_v32, 0.0  ;;  %1161 = vmatprep.subr.bf16.mxu0 %v1160_v18 }
 0x183   :  { %v346_v35 = vmul.f32 %v330_v31, %v314_v33  ;;  %1007 = vmatmul.mubr.f32.gmra.mrb[12].mxu1 %v344_v27  ;;  %1163 = vmatpush3.bf16.msra.mxu0 %v1160_v18  ;;  %v539_v27 = vld [vmem:[#allocation7 + $0x40] sm:$0xff] }
 0x184   :  { %v345_v36 = vmul.f32 %v329_v14, %v313_v34  ;;  %1178 = vmatpush3.bf16.msra.mxu1 %v1156_v39  ;;  %v542_v14 = vld [vmem:[#allocation7 + $0x58] sm:$0xff] }
 0x185   :  { %1171 = vmatprep.subr.bf16.mxu1 %v1160_v18 }
 0x186   :  { %1009 = vmatprep.mubr.f32.mxu1 %v345_v36  ;;  %v541_v36 = vld [vmem:[#allocation7 + $0x50] sm:$0xff] }
 0x187   :  { %1010 = vmatmul.mubr.f32.gmra.mrb[14].mxu1 %v346_v35 }
 0x188   :  { %1179 = vmatpush3.bf16.msra.mxu1 %v1160_v18 }
 0x23e   :  { %v990_v42 = vpop.f32.mrb[0].mxu1 }
 0x23f   :  { %v442_v43 = vadd.f32 %v990_v42, %v1581_v17  ;;  %v436_v44 = vpop.f32.mrb[1].mxu1  ;;  %v544_v42 = vld [vmem:[#allocation7 + $0x68] sm:$0xff] }
 0x240   :  { %v437_v45 = vadd.f32 %v1581_v17, %v436_v44 }
 0x241   :  { %v516_v46 = vmax.f32 %v442_v43, 0.0 }
 0x242   :  { %v515_v49 = vmax.f32 %v437_v45, 0.0  ;;  %v993_v50 = vpop.f32.mrb[2].mxu1  ;;  %v543_v45 = vld [vmem:[#allocation7 + $0x60] sm:$0xff] }
 0x243   :  { %v452_v51 = vadd.f32 %v993_v50, %v1581_v17  ;;  %v446_v52 = vpop.f32.mrb[3].mxu1  ;;  %v548_v56 = vmul.f32 %v532_v48, %v516_v46 }
 0x244   :  { %v547_v53 = vmul.f32 %v531_v47, %v515_v49  ;;  %v447_v55 = vadd.f32 %v1581_v17, %v446_v52  ;;  %v546_v52 = vld [vmem:[#allocation7 + $0x78] sm:$0xff] }
 0x245   :  { %v518_v57 = vmax.f32 %v452_v51, 0.0 }
 0x246   :  { %v517_v59 = vmax.f32 %v447_v55, 0.0  ;;  %1044 = vmatprep.mubr.f32.mxu0 %v547_v53  ;;  %v996_v60 = vpop.f32.mrb[4].mxu1  ;;  %v545_v55 = vld [vmem:[#allocation7 + $0x70] sm:$0xff] }
 0x247   :  { %v550_v61 = vmul.f32 %v534_v54, %v518_v57  ;;  %1045 = vmatmul.mubr.f32.vlgmr.msra.gmra.mrb[16].mxu0 %v548_v56  ;;  %v462_v62 = vadd.f32 %v996_v60, %v1581_v17  ;;  %v456_v63 = vpop.f32.mrb[5].mxu1 }
 0x248   :  { %v549_v0 = vmul.f32 %v533_v58, %v517_v59  ;;  %v457_v2 = vadd.f32 %v1581_v17, %v456_v63  ;;  %v803_v59 = vld [vmem:[%s1622_s8] ss:$0 sm:$0xff]  ;;  %s1365_s8 = smov [#allocation13]  }
 0x249   :  { %v520_v3 = vmax.f32 %v462_v62, 0.0  ;;  %s789_s18 = sshll.u32 %s1365_s8, 4  ;;  %s790_s18 = int_to_ptr.vmem [resolvable:$true] %s789_s18 }
 0x24a   :  { %v519_v5 = vmax.f32 %v457_v2, 0.0  ;;  %1047 = vmatprep.mubr.f32.mxu0 %v549_v0  ;;  %v999_v6 = vpop.f32.mrb[6].mxu1  ;;  %s1325_s19 = scalar_lea.vmem %s790_s18, 32  ;;  %p1330_p7 = scmp.lt.s32.totalorder %s790_s18, %s790_s18 }
 0x24b   :  { %v552_v7 = vmul.f32 %v536_v1, %v520_v3  ;;  %1048 = vmatmul.mubr.f32.gmra.mrb[18].mxu0 %v550_v61  ;;  %v472_v9 = vadd.f32 %v999_v6, %v1581_v17  ;;  %v466_v10 = vpop.f32.mrb[7].mxu1  ;;  %p1326_p6 = scmp.ne.s32.totalorder %s790_s18, %s1325_s19  ;;  %p1331_p8 = scmp.lt.s32.totalorder %s1325_s19, %s1325_s19 }
 0x24c   :  { %v551_v12 = vmul.f32 %v535_v4, %v519_v5  ;;  %v467_v13 = vadd.f32 %v1581_v17, %v466_v10 }
 0x24d   :  { %v522_v15 = vmax.f32 %v472_v9, 0.0  ;;  %p1332_p9 = por %p1331_p8, %p1330_p7 }
 0x24e   :  { %1050 = vmatprep.mubr.f32.mxu0 %v551_v12  ;;  %v521_v19 = vmax.f32 %v467_v13, 0.0  ;;  %v1002_v20 = vpop.f32.mrb[8].mxu1 }
 0x24f   :  { %v554_v21 = vmul.f32 %v538_v8, %v522_v15  ;;  %1051 = vmatmul.mubr.f32.gmra.mrb[20].mxu0 %v552_v7  ;;  %v482_v22 = vadd.f32 %v1002_v20, %v1581_v17  ;;  %v476_v23 = vpop.f32.mrb[9].mxu1  ;;  %p1333_p10 = pnand %p1332_p9, %p1326_p6 }
 0x250   :  { %v553_v24 = vmul.f32 %v537_v16, %v521_v19  ;;  %v477_v25 = vadd.f32 %v1581_v17, %v476_v23 }
 0x251   :  { %v524_v26 = vmax.f32 %v482_v22, 0.0 }
 0x252   :  { %1053 = vmatprep.mubr.f32.mxu0 %v553_v24  ;;  %v523_v28 = vmax.f32 %v477_v25, 0.0  ;;  %v1005_v29 = vpop.f32.mrb[10].mxu1 }
 0x253   :  { %v556_v30 = vmul.f32 %v540_v11, %v524_v26  ;;  %1054 = vmatmul.mubr.f32.gmra.mrb[22].mxu0 %v554_v21  ;;  %v492_v31 = vadd.f32 %v1005_v29, %v1581_v17  ;;  %v486_v32 = vpop.f32.mrb[11].mxu1 }
 0x254   :  { %v555_v33 = vmul.f32 %v539_v27, %v523_v28  ;;  %v487_v34 = vadd.f32 %v1581_v17, %v486_v32 }
 0x255   :  { %v526_v35 = vmax.f32 %v492_v31, 0.0 }
 0x256   :  { %1056 = vmatprep.mubr.f32.mxu1 %v555_v33  ;;  %v525_v37 = vmax.f32 %v487_v34, 0.0  ;;  %v1008_v38 = vpop.f32.mrb[12].mxu1 }
 0x257   :  { %v558_v39 = vmul.f32 %v542_v14, %v526_v35  ;;  %1057 = vmatmul.mubr.f32.vlgmr.msra.gmra.mrb[16].mxu1 %v556_v30  ;;  %v502_v40 = vadd.f32 %v1008_v38, %v1581_v17  ;;  %v496_v41 = vpop.f32.mrb[13].mxu1 }
 0x258   :  { %v557_v18 = vmul.f32 %v541_v36, %v525_v37  ;;  %v497_v43 = vadd.f32 %v1581_v17, %v496_v41 }
 0x259   :  { %v528_v44 = vmax.f32 %v502_v40, 0.0 }
 0x25a   :  { %1059 = vmatprep.mubr.f32.mxu1 %v557_v18  ;;  %v527_v46 = vmax.f32 %v497_v43, 0.0  ;;  %v1011_v47 = vpop.f32.mrb[14].mxu1 }
 0x25b   :  { %v560_v48 = vmul.f32 %v544_v42, %v528_v44  ;;  %1060 = vmatmul.mubr.f32.gmra.mrb[18].mxu1 %v558_v39  ;;  %v512_v49 = vadd.f32 %v1011_v47, %v1581_v17  ;;  %v506_v50 = vpop.f32.mrb[15].mxu1 }
 0x25c   :  { %v559_v51 = vmul.f32 %v543_v45, %v527_v46  ;;  %v507_v53 = vadd.f32 %v1581_v17, %v506_v50 }
 0x25d   :  { %v530_v54 = vmax.f32 %v512_v49, 0.0 }
 0x25e   :  { %1062 = vmatprep.mubr.f32.mxu1 %v559_v51  ;;  %v529_v56 = vmax.f32 %v507_v53, 0.0 }
 0x25f   :  { %v562_v57 = vmul.f32 %v546_v52, %v530_v54  ;;  %1063 = vmatmul.mubr.f32.gmra.mrb[20].mxu1 %v560_v48 }
 0x260   :  { %v561_v58 = vmul.f32 %v545_v55, %v529_v56 }
 0x262   :  { %1065 = vmatprep.mubr.f32.mxu1 %v561_v58 }
 0x263   :  { %1066 = vmatmul.mubr.f32.gmra.mrb[22].mxu1 %v562_v57 }
 0x31a   :  { %v1046_v60 = vpop.f32.mrb[16].mxu0 }
 0x31b   :  { %v652_v61 = vpop.f32.mrb[17].mxu0  ;;  %v658_v17 = vadd.f32 %v1046_v60, %v803_v59 }
 0x31c   :  { %v653_v62 = vadd.f32 %v803_v59, %v652_v61 }
 0x31e   :  { %v1049_v63 = vpop.f32.mrb[18].mxu0  ;;  %731 = vxpose.xlu0.b32.start [1/16] (narrow) %v653_v62, 8 }
 0x31f   :  { %v662_v0 = vpop.f32.mrb[19].mxu0  ;;  %v668_v6 = vadd.f32 %v1049_v63, %v803_v59 }
 0x320   :  { %v663_v3 = vadd.f32 %v803_v59, %v662_v0 }
 0x322   :  { %732 = vxpose.xlu0.b32.cont [2/16] (narrow) %v658_v17, 8  ;;  %v1052_v1 = vpop.f32.mrb[20].mxu0 }
 0x323   :  { %v672_v2 = vpop.f32.mrb[21].mxu0  ;;  %v678_v13 = vadd.f32 %v1052_v1, %v803_v59 }
 0x324   :  { %v673_v10 = vadd.f32 %v803_v59, %v672_v2 }
 0x326   :  { %733 = vxpose.xlu0.b32.cont [3/16] (narrow) %v663_v3, 8  ;;  %v1055_v4 = vpop.f32.mrb[22].mxu0 }
 0x327   :  { %v682_v5 = vpop.f32.mrb[23].mxu0  ;;  %v688_v22 = vadd.f32 %v1055_v4, %v803_v59 }
 0x328   :  { %v683_v19 = vadd.f32 %v803_v59, %v682_v5 }
 0x32a   :  { %734 = vxpose.xlu0.b32.cont [4/16] (narrow) %v668_v6, 8  ;;  %v1058_v7 = vpop.f32.mrb[16].mxu1 }
 0x32b   :  { %v692_v9 = vpop.f32.mrb[17].mxu1  ;;  %v698_v24 = vadd.f32 %v1058_v7, %v803_v59 }
 0x32c   :  { %v693_v23 = vadd.f32 %v803_v59, %v692_v9 }
 0x32e   :  { %735 = vxpose.xlu0.b32.cont [5/16] (narrow) %v673_v10, 8  ;;  %v1061_v12 = vpop.f32.mrb[18].mxu1 }
 0x32f   :  { %v702_v8 = vpop.f32.mrb[19].mxu1  ;;  %v708_v25 = vadd.f32 %v1061_v12, %v803_v59 }
 0x330   :  { %v703_v11 = vadd.f32 %v803_v59, %v702_v8 }
 0x332   :  { %736 = vxpose.xlu0.b32.cont [6/16] (narrow) %v678_v13, 8  ;;  %v1064_v15 = vpop.f32.mrb[20].mxu1 }
 0x333   :  { %v712_v16 = vpop.f32.mrb[21].mxu1  ;;  %v718_v27 = vadd.f32 %v1064_v15, %v803_v59 }
 0x334   :  { %v713_v26 = vadd.f32 %v803_v59, %v712_v16 }
 0x336   :  { %737 = vxpose.xlu0.b32.cont [7/16] (narrow) %v683_v19, 8  ;;  %v1067_v20 = vpop.f32.mrb[22].mxu1 }
 0x337   :  { %v722_v21 = vpop.f32.mrb[23].mxu1  ;;  %v728_v29 = vadd.f32 %v1067_v20, %v803_v59 }
 0x338   :  { %v723_v28 = vadd.f32 %v803_v59, %v722_v21 }
 0x33a   :  { %738 = vxpose.xlu0.b32.cont [8/16] (narrow) %v688_v22, 8 }
 0x33e   :  { %739 = vxpose.xlu0.b32.cont [9/16] (narrow) %v693_v23, 8 }
 0x342   :  { %740 = vxpose.xlu0.b32.cont [10/16] (narrow) %v698_v24, 8 }
 0x346   :  { %741 = vxpose.xlu0.b32.cont [11/16] (narrow) %v703_v11, 8 }
 0x34a   :  { %742 = vxpose.xlu0.b32.cont [12/16] (narrow) %v708_v25, 8 }
 0x34e   :  { %743 = vxpose.xlu0.b32.cont [13/16] (narrow) %v713_v26, 8 }
 0x352   :  { %744 = vxpose.xlu0.b32.cont [14/16] (narrow) %v718_v27, 8 }
 0x356   :  { %745 = vxpose.xlu0.b32.cont [15/16] (narrow) %v723_v28, 8 }
 0x35a   :  { %746 = vxpose.xlu0.b32.end [16/16] (narrow) %v728_v29, 8 }
 0x39e   :  { %v747_v30 = vpop.trf.xlu0 }
 0x39f   :  { %v764_v31 = vand.u32 2147483647, %v747_v30  ;;  %v763_v41 = vmax.f32 %v747_v30, 0.0 }
 0x3a1   :  { %v765_v32 = vsub.f32 0.0, %v764_v31 }
 0x3a3   :  { %v766_v33 = vmul.f32 1.442695, %v765_v32 }
 0x3a5   :  { %1189 = vpow2.f32 %v766_v33 }
 0x3af   :  { %v1190_v14 = vpop.eup %1189 }
 0x3b0   :  { %v768_v34 = vadd.f32 1.0, %v1190_v14  ;;  %v771_v35 = vmul.f32 -0.5, %v1190_v14  ;;  %v774_v37 = vand.u32 2147483647, %v1190_v14 }
 0x3b2   :  { %1191 = vlog2.f32 %v768_v34  ;;  %v772_v36 = vadd.f32 1.0, %v771_v35  ;;  %vm775_vm0 = vcmp.lt.f32.partialorder %v774_v37, 0.0004427343 }
 0x3b4   :  { %v773_v40 = vmul.f32 %v1190_v14, %v772_v36 }
 0x3bc   :  { %v1192_v38 = vpop.eup %1191 }
 0x3bd   :  { %v770_v39 = vmul.f32 0.6931472, %v1192_v38 }
 0x3bf   :  { %v776_v18 = vsel %vm775_vm0, %v773_v40, %v770_v39 }
 0x3c0   :  { %v777_v42 = vadd.f32 %v776_v18, %v763_v41 }
 0x3c2   :  { %v778_v43 = vmul.f32 0.9, %v777_v42 }
 0x3c4   :  { %v779_v44 = vadd.f32 0.1, %v778_v43 }
 0x3c6   :  { %v781_v45 = vsel %vm780_vm1, %v747_v30, %v779_v44 }
 0x3c7   :  { %782 = vst [vmem:[#allocation13] sm:$0x3] %v781_v45 }
 0x3c8   :  { %1336 = shalt.err (!%p1333_p10)
}
 0x3c9   :  { %s1337_s24 = scalar_lea.hbm %s1623_s9, 32 }
 0x3ca   :  { %p1338_p11 = scmp.ne.s32.totalorder %s1623_s9, %s1337_s24  ;;  %p1341_p12 = scmp.lt.u32.totalorder %s1337_s24, %s1623_s9 }
 0x3cc   :  { %p1343_p13 = pnand %p1341_p12, %p1338_p11 }
 0x3ce   :  { %1346 = shalt.err (!%p1343_p13)
}
 0x3cf   :  { %792 = dma.vmem_to_hbm [thread:$0]  %s790_s18, 32, %s1623_s9, [#allocation4]  }
 0x3d0   :  { %1355 = dma.done.wait [#allocation4], 32  }
 0x3d1   :  { %1356 = vsyncadd [#allocation4], 4294967264 }
 0x3d2   :  { %796 = vsyncpa [#allocation3], 1 }
 0x3d3   :  { %797 = vsyncpa [#allocation6], 1 }
 0x3d4   :  { %798 = vsyncpa [#allocation9], 1 }
 0x3d5   :  { %799 = vsyncpa [#allocation12], 1 }
 0x3d6   :  { %800 = vsyncpa [#allocation4], 1 }

</bundles_post_ra>
